<compile_context>
chip_gen: v7x
topology: tpu7x:2x2x1
jax: 0.10.0
libtpu: 0.0.40
codegen_flags: <defaults>
</compile_context>

<pallas_src>
import functools

import jax
import jax.numpy as jnp
from jax import lax
from jax.experimental import pallas as pl
from jax.experimental.pallas import tpu as pltpu

PATCH = 8            # RAFT works at 1/8 resolution
FEAT = 128           # feature dim   (128 => lane-dense, full MXU width)
HIDDEN = 128         # GRU hidden dim (128 => lane-dense, full MXU width)


def _pick_row_tile(m, target):
    """Largest legal row tile: multiple of 8 (or the full extent) capped at `target`."""
    if m % 8 != 0:
        return m                 # only a full block is legal
    return min(m, target)


def _pick_kv_tile(n, target=512):
    """Largest multiple-of-128 divisor of n capped at target; else the full extent."""
    if n <= target:
        return n
    for t in range(target - target % 128, 127, -128):
        if n % t == 0:
            return t
    return n


def _vmem_limit_bytes():
    """Generation-aware scoped-VMEM limit: headroom under 64 MiB on v7x, larger on v5e/v6e."""
    try:
        cap = pltpu.get_tpu_info().vmem_capacity_bytes
    except Exception:
        cap = 128 * 1024 * 1024
    return int(min(cap * 3 // 4, 96 * 1024 * 1024))


def _maybe_buffered(shape, index_map, bufs):
    """BlockSpec with an explicit buffer count if this JAX supports pipeline_mode."""
    try:
        return pl.BlockSpec(shape, index_map, pipeline_mode=pl.Buffered(bufs))
    except (TypeError, AttributeError):
        return pl.BlockSpec(shape, index_map)


# ----------------------------------------------------------------------------
# Pallas kernels
# ----------------------------------------------------------------------------
def _encoder_kernel(p_ref, w_ref, b_ref, o_ref):
    # fused patch-conv-as-matmul (bf16 MXU inputs, f32 acc) + bias + relu
    y = jnp.dot(p_ref[...], w_ref[...], preferred_element_type=jnp.float32)
    o_ref[...] = jnp.maximum(y + b_ref[...], 0.0)


def _raft_core_kernel(f1_ref, f2_ref, f2t_ref, wcx_ref, whzr_ref, wqh_ref,
                      wfh_ref, whd_ref, flow_ref, *, iters, scale, hidden, kv_tile):
    """Fused: KV-tiled correlation + online softmax + attend + `iters` GRU steps + flow.

    Runs on one (batch, query-row-tile) grid cell.  Everything (score tile, ctx, h,
    h_acc, fg) lives in VMEM/vregs; only the final flow tile is written to HBM.
    """
    H = hidden
    TQ, F = f1_ref.shape[1], f1_ref.shape[2]
    N = f2_ref.shape[1]
    n_chunks = N // kv_tile

    # fold 1/sqrt(F) into the (small) query tile once; bf16 for the MXU
    f1s = (f1_ref[0] * scale).astype(jnp.bfloat16)                     # [TQ, F]

    # --- flash-style correlation lookup: [TQ, N] scores never materialized ---
    def kv_step(c, carry):
        m, l, acc = carry
        off = c * kv_tile
        if isinstance(off, int) and kv_tile == N:
            kT = f2t_ref[0]                                            # [F, N]  bf16
            v = f2_ref[0]                                              # [N, F]  bf16
        else:
            if not isinstance(off, int):
                off = pl.multiple_of(off, kv_tile)
            kT = f2t_ref[0, :, pl.ds(off, kv_tile)]                    # [F, TK] bf16
            v = f2_ref[0, pl.ds(off, kv_tile), :]                      # [TK, F] bf16
        s = jnp.dot(f1s, kT, preferred_element_type=jnp.float32)       # [TQ, TK] f32
        m_new = jnp.maximum(m, jnp.max(s, axis=-1, keepdims=True))
        alpha = jnp.exp(m - m_new)
        # NOTE: on v6e/v7x casting (s - m_new) to bf16 before exp would ~2x EUP
        # throughput; kept f32 so the same kernel stays correct/fast on v5e.
        p = jnp.exp(s - m_new)
        l = alpha * l + jnp.sum(p, axis=-1, keepdims=True)
        acc = alpha * acc + jnp.dot(p.astype(jnp.bfloat16), v,
                                    preferred_element_type=jnp.float32)
        return m_new, l, acc

    init = (jnp.full((TQ, 1), -jnp.inf, jnp.float32),
            jnp.zeros((TQ, 1), jnp.float32),
            jnp.zeros((TQ, F), jnp.float32))
    if n_chunks <= 2:
        carry = init
        for c in range(n_chunks):
            carry = kv_step(c, carry)
        _, l, acc = carry
    else:
        _, l, acc = lax.fori_loop(0, n_chunks, kv_step, init)
    ctx = acc * pl.reciprocal(l, approx=True)                          # [TQ, F] softmax-normalized

    # loop-invariant: ctx projection onto all three gates (z | r | q), hoisted
    cg = jnp.dot(ctx.astype(jnp.bfloat16), wcx_ref[...],
                 preferred_element_type=jnp.float32)                   # [TQ, 3H]

    whzr = whzr_ref[...]                                               # [H, 2H] bf16 (fused z|r)
    wqh = wqh_ref[...]                                                 # [H, H]  bf16
    wfh = wfh_ref[...]                                                 # [H, 3H] bf16 (= w_head @ w_flow)

    def gru_step(_, carry):
        h, h_acc, fg = carry
        hzr = jnp.dot(h.astype(jnp.bfloat16), whzr,
                      preferred_element_type=jnp.float32)              # [TQ, 2H]
        g = cg + fg
        z = jax.nn.sigmoid(hzr[:, :H] + g[:, :H])
        r = jax.nn.sigmoid(hzr[:, H:] + g[:, H:2 * H])
        q = jnp.tanh(jnp.dot((r * h).astype(jnp.bfloat16), wqh,
                             preferred_element_type=jnp.float32) + g[:, 2 * H:])
        h = (1.0 - z) * h + z * q
        h_acc = h_acc + h
        # fg == flow @ w_flow maintained lane-densely (flow == h_acc @ w_head)
        fg = fg + jnp.dot(h.astype(jnp.bfloat16), wfh,
                          preferred_element_type=jnp.float32)
        return h, h_acc, fg

    zeros = lambda d: jnp.zeros((TQ, d), jnp.float32)
    _, h_acc, _ = lax.fori_loop(0, iters, gru_step,
                                (zeros(H), zeros(H), zeros(3 * H)),
                                unroll=(iters <= 4))
    # flow = sum_t h_t @ w_head == h_acc @ w_head   (flow starts at zero)
    flow_ref[0] = jnp.dot(h_acc, whd_ref[...], preferred_element_type=jnp.float32)


# ----------------------------------------------------------------------------
# Pallas wrappers
# ----------------------------------------------------------------------------
def patch_encoder(x_nchw, w, b):
    """8x8 stride-8 conv (via im2col matmul). x: [B,C,H,W] -> [B,N,F]."""
    B, C, H, W = x_nchw.shape
    H8, W8 = H // PATCH, W // PATCH
    N = H8 * W8
    M = B * N
    p = x_nchw.reshape(B, C, H8, PATCH, W8, PATCH)
    p = jnp.transpose(p, (0, 2, 4, 3, 5, 1)).reshape(M, PATCH * PATCH * C)
    p = p.astype(jnp.bfloat16)
    wb = w.astype(jnp.bfloat16)
    K, F = w.shape
    TM = _pick_row_tile(M, 2048)
    out = pl.pallas_call(
        _encoder_kernel,
        grid=(pl.cdiv(M, TM),),
        in_specs=[pl.BlockSpec((TM, K), lambda i: (i, 0)),
                  _maybe_buffered((K, F), lambda i: (0, 0), 1),
                  _maybe_buffered((1, F), lambda i: (0, 0), 1)],
        out_specs=pl.BlockSpec((TM, F), lambda i: (i, 0)),
        out_shape=jax.ShapeDtypeStruct((M, F), jnp.float32),
        compiler_params=pltpu.CompilerParams(dimension_semantics=("parallel",)),
    )(p, wb, b)
    return out.reshape(B, N, F)


def raft_core_flow(f1, f2, P, iters):
    """Fused correlation + attention + iterative GRU refinement. Returns flow [B,N,2]."""
    B, N, F = f1.shape
    Hd = P["w_qh"].shape[0]
    TQ = _pick_row_tile(N, 256)        # query-row tile
    TK = _pick_kv_tile(N, 512)         # key/value chunk for the online softmax

    # bf16 copies of the big operands + a pre-transposed key layout (avoids any
    # per-grid-cell XLU transpose inside the correlation dot)
    f2b = f2.astype(jnp.bfloat16)                                      # [B, N, F]
    f2t = jnp.transpose(f2b, (0, 2, 1))                                # [B, F, N]
    wcx = P["w_ctx"].astype(jnp.bfloat16)
    whzr = P["w_hzr"].astype(jnp.bfloat16)
    wqh = P["w_qh"].astype(jnp.bfloat16)
    # W_fh = w_head @ w_flow -> keeps the flow->gate path lane-dense inside the loop
    wfh = jnp.dot(P["w_head"], P["w_flow"]).astype(jnp.bfloat16)       # [H, 3H]
    whd = P["w_head"]                                                  # [H, 2] f32 (tiny final matmul)

    kernel = functools.partial(_raft_core_kernel, iters=iters,
                               scale=1.0 / float(F) ** 0.5, hidden=Hd, kv_tile=TK)
    const = lambda shape: _maybe_buffered(shape, lambda b, q: (0, 0), 1)
    return pl.pallas_call(
        kernel,
        grid=(B, pl.cdiv(N, TQ)),
        in_specs=[pl.BlockSpec((1, TQ, F), lambda b, q: (b, q, 0)),          # f1 query tile (f32)
                  _maybe_buffered((1, N, F), lambda b, q: (b, 0, 0), 1),     # f2 values (bf16)
                  _maybe_buffered((1, F, N), lambda b, q: (b, 0, 0), 1),     # f2^T keys (bf16)
                  const((F, 3 * Hd)),                                        # w_ctx
                  const((Hd, 2 * Hd)),                                       # w_hzr (fused z|r)
                  const((Hd, Hd)),                                           # w_qh
                  const((Hd, 3 * Hd)),                                       # w_fh = w_head @ w_flow
                  const((Hd, 2))],                                           # w_head
        out_specs=pl.BlockSpec((1, TQ, 2), lambda b, q: (b, q, 0)),
        out_shape=jax.ShapeDtypeStruct((B, N, 2), jnp.float32),
        compiler_params=pltpu.CompilerParams(
            dimension_semantics=("parallel", "parallel"),
            vmem_limit_bytes=_vmem_limit_bytes()),
    )(f1, f2b, f2t, wcx, whzr, wqh, wfh, whd)


def recover_rgb(x):
    # Trivial elementwise op: XLA fuses (x+1)*127.5 for free; a pallas_call here is
    # pure launch overhead on a lane-misaligned NCHW block.
    return (x + 1.0) * 127.5


# ----------------------------------------------------------------------------
# RAFT-style sub-networks
# ----------------------------------------------------------------------------
def _upsample_flow_x8(flow_tokens, H8, W8):
    # TODO(synk): RAFT uses a learned convex-combination (mask) upsampler; replaced with nearest-neighbour x8.
    B = flow_tokens.shape[0]
    f = flow_tokens.reshape(B, H8, W8, 2)
    f = jnp.repeat(jnp.repeat(f, PATCH, axis=1), PATCH, axis=2) * float(PATCH)
    return jnp.transpose(f, (0, 3, 1, 2))          # NCHW [B, 2, H, W]


def _raft_core(f1, f2, P, iters, H8, W8):
    flow = raft_core_flow(f1, f2, P, iters)        # [B, N, 2]
    B = flow.shape[0]
    flow_low = jnp.transpose(flow.reshape(B, H8, W8, 2), (0, 3, 1, 2))
    flow_up = _upsample_flow_x8(flow, H8, W8)
    return flow_low, flow_up


def raft_i2d_forward(P, dense_depth, frame, lidar_mask, iters, f1=None):
    """image2depth RAFT: img1 = (dense_depth, lidar_mask), img2 = rgb frame."""
    _, _, H, W = frame.shape
    H8, W8 = H // PATCH, W // PATCH
    if f1 is None:
        x1 = jnp.concatenate([dense_depth, lidar_mask], axis=1)   # [B, 2, H, W]
        f1 = patch_encoder(x1, P["enc1_w"], P["enc1_b"])
    f2 = patch_encoder(frame, P["enc2_w"], P["enc2_b"])
    return _raft_core(f1, f2, P, iters, H8, W8)


def raft_f2f_forward(P, frame1, frame2, iters):
    """image2image RAFT (RAFT_f2f): shared rgb feature encoder."""
    _, _, H, W = frame1.shape
    H8, W8 = H // PATCH, W // PATCH
    f1 = patch_encoder(frame1, P["enc1_w"], P["enc1_b"])
    f2 = patch_encoder(frame2, P["enc1_w"], P["enc1_b"])
    return _raft_core(f1, f2, P, iters, H8, W8)


# ----------------------------------------------------------------------------
# I2D_VO forward
# ----------------------------------------------------------------------------
def i2d_vo_forward(params, cur_frame, next_frame, dense_depth, sparse_depth,
                   iters, tight_couple=True):
    Pa = params["image2depth_net_a"]
    # depth-branch features are identical for both image2depth calls: encode once
    x1 = jnp.concatenate([dense_depth, sparse_depth], axis=1)
    f1_depth = patch_encoder(x1, Pa["enc1_w"], Pa["enc1_b"])

    _, i2d_flow_up_cur = raft_i2d_forward(
        Pa, dense_depth, cur_frame, sparse_depth, iters, f1=f1_depth)
    if tight_couple:
        _, i2d_flow_up_next = raft_i2d_forward(
            Pa, dense_depth, next_frame, sparse_depth, iters, f1=f1_depth)
        cur_rgb = recover_rgb(cur_frame)
        next_rgb = recover_rgb(next_frame)
        _, i2i_flow_up = raft_f2f_forward(
            params["image2image_net"], cur_rgb, next_rgb, iters)
        return (i2d_flow_up_cur, i2d_flow_up_next, i2i_flow_up)
    return i2d_flow_up_cur


# ----------------------------------------------------------------------------
# deterministic parameter init (weights stored pre-fused for the wide matmuls)
# ----------------------------------------------------------------------------
def init_raft_params(key, c1, c2, feat=FEAT, hidden=HIDDEN):
    ks = jax.random.split(key, 7)
    w = lambda k, s: 0.05 * jax.random.normal(k, s, jnp.float32)
    return dict(
        enc1_w=w(ks[0], (PATCH * PATCH * c1, feat)),
        enc1_b=jnp.zeros((1, feat), jnp.float32),
        enc2_w=w(ks[1], (PATCH * PATCH * c2, feat)),
        enc2_b=jnp.zeros((1, feat), jnp.float32),
        w_ctx=w(ks[2], (feat, 3 * hidden)),     # ctx -> [z | r | q] gates (fused)
        w_hzr=w(ks[3], (hidden, 2 * hidden)),   # h   -> [z | r] gates     (fused)
        w_qh=w(ks[4], (hidden, hidden)),        # (r*h) -> q gate
        w_flow=w(ks[5], (2, 3 * hidden)),       # flow -> [z | r | q] gates
        w_head=w(ks[6], (hidden, 2)),           # h -> dflow
    )


if __name__ == "__main__":
    key = jax.random.PRNGKey(0)
    kcur, knext, kd, ks, kp1, kp2, kp3 = jax.random.split(key, 7)
    B, H, W = 2, 16, 16
    cur_frame = jax.random.uniform(kcur, (B, 3, H, W), jnp.float32, -1.0, 1.0)
    next_frame = jax.random.uniform(knext, (B, 3, H, W), jnp.float32, -1.0, 1.0)
    dense_depth = jax.random.uniform(kd, (B, 1, H, W), jnp.float32, 0.0, 1.0)
    sparse_depth = jax.random.uniform(ks, (B, 1, H, W), jnp.float32, 0.0, 1.0)

    params = dict(
        image2depth_net_a=init_raft_params(kp1, c1=2, c2=3),
        # image2depth_net_b is constructed by the PyTorch module but never used in forward()
        image2depth_net_b=init_raft_params(kp2, c1=2, c2=3),
        image2image_net=init_raft_params(kp3, c1=3, c2=3),
    )

    flow_cur, flow_next, flow_i2i = i2d_vo_forward(
        params, cur_frame, next_frame, dense_depth, sparse_depth,
        iters=2, tight_couple=True)
    jax.block_until_ready((flow_cur, flow_next, flow_i2i))

    assert flow_cur.shape == (B, 2, H, W)
    assert flow_next.shape == (B, 2, H, W)
    assert flow_i2i.shape == (B, 2, H, W)
    print("KERNEL_OK")
</pallas_src>

<mosaic_0001>
module attributes {stable_mosaic.version = 11 : i64} {
  func.func @_encoder_kernel(%arg0: i32, %arg1: memref<8x128xbf16, #tpu.memory_space<vmem>>, %arg2: memref<128x128xbf16, #tpu.memory_space<vmem>>, %arg3: memref<1x128xf32, #tpu.memory_space<vmem>>, %arg4: memref<8x128xf32, #tpu.memory_space<vmem>>) attributes {dimension_semantics = [#tpu.dimension_semantics<parallel>], iteration_bounds = array<i64: 1>, scalar_prefetch = 0 : i64, scratch_operands = 0 : i64, tpu.core_type = #tpu.core_type<tc>, window_params = [{transform_indices = @transform_0, window_bounds = array<i64: 8, 128>}, {pipeline_mode = #tpu.pipeline_mode<synchronous>, transform_indices = @transform_1, window_bounds = array<i64: 128, 128>}, {pipeline_mode = #tpu.pipeline_mode<synchronous>, transform_indices = @transform_2, window_bounds = array<i64: 1, 128>}, {transform_indices = @transform_3, window_bounds = array<i64: 8, 128>}]} {
    %c0 = arith.constant 0 : index
    %c0_0 = arith.constant 0 : index
    %0 = vector.load %arg1[%c0, %c0_0] : memref<8x128xbf16, #tpu.memory_space<vmem>>, vector<8x128xbf16>
    %c0_1 = arith.constant 0 : index
    %c0_2 = arith.constant 0 : index
    %1 = vector.load %arg2[%c0_1, %c0_2] : memref<128x128xbf16, #tpu.memory_space<vmem>>, vector<128x128xbf16>
    %cst = arith.constant dense<0.000000e+00> : vector<8x128xf32>
    %2 = tpu.matmul %0, %1, %cst {dimension_numbers = #tpu.dot_dimension_numbers<[1], [0], [0], [1], [0, 0, 1, 1], [], []>} : vector<8x128xbf16>, vector<128x128xbf16>, vector<8x128xf32> -> vector<8x128xf32>
    %c0_3 = arith.constant 0 : index
    %c0_4 = arith.constant 0 : index
    %3 = vector.load %arg3[%c0_3, %c0_4] : memref<1x128xf32, #tpu.memory_space<vmem>>, vector<1x128xf32>
    %4 = vector.broadcast %3 : vector<1x128xf32> to vector<8x128xf32>
    %5 = arith.addf %2, %4 : vector<8x128xf32>
    %cst_5 = arith.constant 0.000000e+00 : f32
    %6 = vector.broadcast %cst_5 : f32 to vector<8x128xf32>
    %7 = arith.maximumf %5, %6 : vector<8x128xf32>
    %c0_6 = arith.constant 0 : index
    %c0_7 = arith.constant 0 : index
    %8 = vector.load %arg4[%c0_6, %c0_7] : memref<8x128xf32, #tpu.memory_space<vmem>>, vector<8x128xf32>
    tpu.vector_store %arg4[%c0_6, %c0_7], %7 {strides = array<i32>} : memref<8x128xf32, #tpu.memory_space<vmem>>, vector<8x128xf32>,
    return
  }
  func.func @transform_0(%arg0: i32) -> (i32, i32) {
    %c0_i32 = arith.constant 0 : i32
    %c0_i32_0 = arith.constant 0 : i32
    return %arg0, %c0_i32 : i32, i32
  }
  func.func @transform_1(%arg0: i32) -> (i32, i32) {
    %c0_i32 = arith.constant 0 : i32
    %c0_i32_0 = arith.constant 0 : i32
    %c0_i32_1 = arith.constant 0 : i32
    return %c0_i32, %c0_i32_0 : i32, i32
  }
  func.func @transform_2(%arg0: i32) -> (i32, i32) {
    %c0_i32 = arith.constant 0 : i32
    %c0_i32_0 = arith.constant 0 : i32
    %c0_i32_1 = arith.constant 0 : i32
    return %c0_i32, %c0_i32_0 : i32, i32
  }
  func.func @transform_3(%arg0: i32) -> (i32, i32) {
    %c0_i32 = arith.constant 0 : i32
    %c0_i32_0 = arith.constant 0 : i32
    return %arg0, %c0_i32 : i32, i32
  }
}

</mosaic_0001>

<bundles_post_ra>
// kernel: tpu_custom_call.1
= control target key start
LH: loop header
LB: loop body
LE: loop exit
PB: predicated region body
PF: predicated region fallthrough
CT: control target
= control target key end

     0   :  { %8 = vsyncpa [#allocation3], 0  ;;  %s370_s0 = inlined_call_operand.hbm [shape: bf16[8,128], index: 0, kind: input, shape index: {}]   ;;  %s371_s1 = inlined_call_operand.hbm [shape: bf16[128,128], index: 1, kind: input, shape index: {}]   ;;  %s372_s2 = inlined_call_operand.vmem [shape: f32[1,128], index: 2, kind: input, shape index: {}]   ;;  %s373_s3 = inlined_call_operand.hbm [shape: f32[8,128], index: 3, kind: output, shape index: {}]  }
   0x1   :  { %9 = vsyncpa [#allocation6], 0 }
   0x2   :  { %10 = vsyncpa [#allocation4], 0  ;;  %s297_s12 = smov [#allocation2]   ;;  %s298_s14 = smov [#allocation5]  }
   0x3   :  { %s17_s13 = sshll.u32 %s297_s12, 4  ;;  %s26_s15 = sshll.u32 %s298_s14, 4  ;;  %s18_s13 = int_to_ptr.vmem [resolvable:$true] %s17_s13  ;;  %s324_s15 = int_to_ptr.vmem [resolvable:$true] %s26_s15 }
   0x4   :  { %s225_s18 = scalar_lea.hbm %s370_s0, 64 }
   0x5   :  { %p226_p0 = scmp.ne.s32.totalorder %s370_s0, %s225_s18  ;;  %p229_p1 = scmp.lt.u32.totalorder %s225_s18, %s370_s0 }
   0x7   :  { %p231_p2 = pnand %p229_p1, %p226_p0 }
   0x9   :  { %234 = shalt.err (!%p231_p2)
}
   0xa   :  { %s235_s23 = scalar_lea.vmem %s18_s13, 64  ;;  %p240_p4 = scmp.lt.s32.totalorder %s18_s13, %s18_s13 }
   0xb   :  { %p236_p3 = scmp.ne.s32.totalorder %s18_s13, %s235_s23  ;;  %p241_p5 = scmp.lt.s32.totalorder %s235_s23, %s235_s23 }
   0xd   :  { %p242_p6 = por %p241_p5, %p240_p4 }
   0xf   :  { %p243_p7 = pnand %p242_p6, %p236_p3 }
  0x11   :  { %246 = shalt.err (!%p243_p7)
}
  0x12   :  { %20 = dma.hbm_to_vmem [thread:$0]  %s370_s0, 64, %s18_s13, [#allocation3]  }
  0x13   :  { %s247_s28 = scalar_lea.hbm %s371_s1, 1024 }
  0x14   :  { %p248_p8 = scmp.ne.s32.totalorder %s371_s1, %s247_s28  ;;  %p251_p9 = scmp.lt.u32.totalorder %s247_s28, %s371_s1 }
  0x16   :  { %p253_p10 = pnand %p251_p9, %p248_p8 }
  0x18   :  { %256 = shalt.err (!%p253_p10)
}
  0x19   :  { %s257_s6 = scalar_lea.vmem %s324_s15, 1024  ;;  %p262_p12 = scmp.lt.s32.totalorder %s324_s15, %s324_s15 }
  0x1a   :  { %p258_p11 = scmp.ne.s32.totalorder %s324_s15, %s257_s6  ;;  %p263_p13 = scmp.lt.s32.totalorder %s257_s6, %s257_s6 }
  0x1c   :  { %p264_p0 = por %p263_p13, %p262_p12 }
  0x1e   :  { %p265_p1 = pnand %p264_p0, %p258_p11 }
  0x20   :  { %268 = shalt.err (!%p265_p1)
}
  0x21   :  { %s299_s0 = smov 64   ;;  %s300_s7 = smov 4  }
  0x22   :  { %32 = dma.hbm_to_vmem [thread:$0]  %s371_s1, 1024, %s324_s15, [#allocation6], %s299_s0, %s299_s0, %s300_s7  }
  0x23   :  { %291 = dma.done.wait [#allocation3], 64  }
  0x24   :  { %292 = vsyncadd [#allocation3], 4294967232 }
  0x25   :  { %293 = dma.done.wait [#allocation6], 1024  }
  0x26   :  { %294 = vsyncadd [#allocation6], 4294966272  ;;  %v301_v0 = vmov 0.0   ;;  %vm302_vm0 = vmmov 0   ;;  %v217_v1 = vld [vmem:[#allocation5] sm:$0xff]   ;;  %v218_v2 = vld [vmem:[#allocation5 + $0x8] sm:$0xff]  }
  0x27   :  { %190 = vmatprep.subr.bf16.mxu0 %v301_v0  ;;  %206 = vmatprep.mubr.msk.bf16.mxu0 %vm302_vm0, %v301_v0  ;;  %v219_v3 = vld [vmem:[#allocation5 + $0x10] sm:$0xff]   ;;  %v220_v4 = vld [vmem:[#allocation5 + $0x18] sm:$0xff]   ;;  %v221_v5 = vld [vmem:[#allocation5 + $0x20] sm:$0xff]   ;;  %s303_s11 = smov [#allocation7]  }
  0x28   :  { %191 = vmatpush3.bf16.msra.mxu0 %v217_v1  ;;  %v222_v6 = vld [vmem:[#allocation5 + $0x28] sm:$0xff]   ;;  %v223_v7 = vld [vmem:[#allocation5 + $0x30] sm:$0xff]   ;;  %v224_v8 = vld [vmem:[#allocation5 + $0x38] sm:$0xff]   ;;  %s162_s12 = sshll.u32 %s303_s11, 4  ;;  %s163_s12 = int_to_ptr.vmem [resolvable:$true] %s162_s12 }
  0x29   :  { %192 = vmatprep.subr.bf16.mxu0 %v301_v0  ;;  %v42_v9 = vld [vmem:[#allocation2] sm:$0xf]  ;;  %s269_s13 = scalar_lea.vmem %s163_s12, 128  ;;  %p274_p3 = scmp.lt.s32.totalorder %s163_s12, %s163_s12 }
  0x2a   :  { %v172_v10 = vld [vmem:[%s372_s2] ss:$0 sm:$0xff]  ;;  %p270_p2 = scmp.ne.s32.totalorder %s163_s12, %s269_s13  ;;  %p275_p4 = scmp.lt.s32.totalorder %s269_s13, %s269_s13 }
  0x2c   :  { %193 = vmatpush3.bf16.msra.mxu0 %v218_v2  ;;  %p276_p5 = por %p275_p4, %p274_p3 }
  0x2d   :  { %194 = vmatprep.subr.bf16.mxu0 %v301_v0 }
  0x2e   :  { %p277_p6 = pnand %p276_p5, %p270_p2 }
  0x30   :  { %195 = vmatpush3.bf16.msra.mxu0 %v219_v3 }
  0x31   :  { %196 = vmatprep.subr.bf16.mxu0 %v301_v0 }
  0x34   :  { %197 = vmatpush3.bf16.msra.mxu0 %v220_v4 }
  0x35   :  { %198 = vmatprep.subr.bf16.mxu0 %v301_v0 }
  0x38   :  { %199 = vmatpush3.bf16.msra.mxu0 %v221_v5 }
  0x39   :  { %200 = vmatprep.subr.bf16.mxu0 %v301_v0 }
  0x3c   :  { %201 = vmatpush3.bf16.msra.mxu0 %v222_v6 }
  0x3d   :  { %202 = vmatprep.subr.bf16.mxu0 %v301_v0 }
  0x40   :  { %203 = vmatpush3.bf16.msra.mxu0 %v223_v7 }
  0x41   :  { %204 = vmatprep.subr.bf16.mxu0 %v301_v0 }
  0x44   :  { %205 = vmatpush3.bf16.msra.mxu0 %v224_v8 }
  0x47   :  { %207 = vmatmul.mubr.bf16.vlgmr.msra.gmra.mrb[0].mxu0 %v42_v9 }
 0x11a   :  { %v148_v11 = vpop.f32.mrb[0].mxu0 }
 0x11b   :  { %v149_v12 = vadd.f32 %v172_v10, %v148_v11  ;;  %v208_v13 = vpop.f32.mrb[1].mxu0 }
 0x11c   :  { %v151_v14 = vpop.f32.mrb[2].mxu0 }
 0x11d   :  { %v154_v15 = vmax.f32 %v149_v12, 0.0  ;;  %v209_v16 = vpop.f32.mrb[3].mxu0 }
 0x11f   :  { %155 = vst [vmem:[#allocation7] sm:$0xff] %v154_v15 }
 0x120   :  { %280 = shalt.err (!%p277_p6)
}
 0x121   :  { %s281_s2 = scalar_lea.hbm %s373_s3, 128 }
 0x122   :  { %p282_p7 = scmp.ne.s32.totalorder %s373_s3, %s281_s2  ;;  %p285_p8 = scmp.lt.u32.totalorder %s281_s2, %s373_s3 }
 0x124   :  { %p287_p9 = pnand %p285_p8, %p282_p7 }
 0x126   :  { %290 = shalt.err (!%p287_p9)
}
 0x127   :  { %165 = dma.vmem_to_hbm [thread:$0]  %s163_s12, 128, %s373_s3, [#allocation4]  }
 0x128   :  { %295 = dma.done.wait [#allocation4], 128  }
 0x129   :  { %296 = vsyncadd [#allocation4], 4294967168 }
 0x12a   :  { %169 = vsyncpa [#allocation3], 1 }
 0x12b   :  { %170 = vsyncpa [#allocation6], 1 }
 0x12c   :  { %171 = vsyncpa [#allocation4], 1 }

</bundles_post_ra>
